<compile_context>
chip_gen: v7x
topology: tpu7x:2x2x1
jax: 0.10.0
libtpu: 0.0.40
codegen_flags: <defaults>
</compile_context>

<pallas_src>
import jax
import jax.numpy as jnp
from jax import lax
from jax.experimental import pallas as pl
from jax.experimental.pallas import tpu as pltpu


def _sigmoid(x):
    # tanh-based sigmoid (EUP tanh + VPU fma); same form in kernel + reference.
    return 0.5 * jnp.tanh(0.5 * x) + 0.5


def _split_model1_kernel(x_ref, w4_ref, vec_ref, scal_ref, out_ref, h5_ref, z_acc):
    k = pl.program_id(0)
    nk = pl.num_programs(0)

    @pl.when(k == 0)
    def _():
        z_acc[...] = jnp.zeros_like(z_acc)

    # hidden4 partial contraction: x tile (1, tk) against w4 tile (D, tk),
    # contracting the in-dim (axis 1 of both) on the MXU -> (1, D). The weight
    # is consumed in its native torch (out, in) layout; no HBM-side transpose.
    z_acc[...] += lax.dot_general(
        x_ref[...], w4_ref[...],
        dimension_numbers=(((1,), (1,)), ((), ())),
        preferred_element_type=jnp.float32)

    @pl.when(k == nk - 1)
    def _():
        vec = vec_ref[...]                               # (4, D): b4, gamma, beta, wp
        b4, gamma, beta, wp = vec[0:1], vec[1:2], vec[2:3], vec[3:4]

        h = _sigmoid(z_acc[...] + b4)                    # (1, D)

        # One-pass LayerNorm stats (torch default eps = 1e-5).
        d = h.shape[-1]
        inv_d = 1.0 / d
        s1 = jnp.sum(h, axis=-1, keepdims=True)
        s2 = jnp.sum(h * h, axis=-1, keepdims=True)
        mu = s1 * inv_d
        var = s2 * inv_d - mu * mu
        hn = (h - mu) * lax.rsqrt(var + 1e-5) * gamma + beta   # (1, D)

        # hidden5 = sigmoid(Linear(1,1)(hn^T)) is a scalar affine; compute it
        # lane-dense as (1, D) == hidden5.T (no transpose, no 1-wide matmul).
        w5 = scal_ref[0]
        b5 = scal_ref[1]
        bp = scal_ref[2]
        h5 = _sigmoid(hn * w5 + b5)                      # (1, D)
        h5_ref[...] = h5

        # predict: rank-1 contraction -> VPU mul + lane reduce; scalar to SMEM.
        out_ref[0, 0] = jnp.sum(h5 * wp) + bp


def _pick_tk(d):
    """Contraction-tile size: whole weight if small, else lane-aligned tiles."""
    if d * d * 4 <= 8 * 1024 * 1024:          # whole DxD weight is small enough
        return d
    best = None
    tk = 128
    while tk <= d:
        if d % tk == 0:
            best = tk
            if d * tk * 4 >= 2 * 1024 * 1024:  # ~2-4 MiB weight tiles
                break
        tk += 128
    return best if best is not None else d


def pack_params(params):
    """One-time param packing, hoisted out of the per-call hot path."""
    w4, b4, gamma, beta, w5, b5, wp, bp = params
    d = w4.shape[0]
    vec = jnp.stack([b4, gamma, beta, wp.reshape(d)], axis=0).astype(jnp.float32)   # (4, D)
    scal = jnp.stack(
        [w5.reshape(()), b5.reshape(()), bp.reshape(())]).astype(jnp.float32)       # (3,)
    return (w4.astype(jnp.float32), vec, scal)


@jax.jit
def split_model1(arrays, packed):
    """arrays: (1, D) f32. packed: pack_params(...). Returns (out (1,1), hidden5 (D,1))."""
    w4, vec, scal = packed
    d = arrays.shape[1]
    tk = _pick_tk(d)
    nk = d // tk

    # Double-buffered weight + x tiles, vec slab, h5 out, z accumulator + slack.
    vmem_est = 4 * (2 * d * tk + 2 * tk + 4 * d + d + d) + (2 << 20)
    vmem_limit = min(max(vmem_est, 16 * 1024 * 1024), 64 * 1024 * 1024)

    out, h5_row = pl.pallas_call(
        _split_model1_kernel,
        out_shape=(jax.ShapeDtypeStruct((1, 1), jnp.float32),
                   jax.ShapeDtypeStruct((1, d), jnp.float32)),
        grid_spec=pltpu.PrefetchScalarGridSpec(
            num_scalar_prefetch=0,
            grid=(nk,),
            in_specs=[
                pl.BlockSpec((1, tk), lambda k: (0, k)),            # x
                pl.BlockSpec((d, tk), lambda k: (0, k)),            # w4 (out, in)
                pl.BlockSpec((4, d), lambda k: (0, 0)),             # packed vectors
                pl.BlockSpec(memory_space=pltpu.MemorySpace.SMEM),  # packed scalars
            ],
            out_specs=(
                pl.BlockSpec(memory_space=pltpu.MemorySpace.SMEM),  # (1,1) output
                pl.BlockSpec((1, d), lambda k: (0, 0)),             # lane-dense h5
            ),
            scratch_shapes=[pltpu.VMEM((1, d), jnp.float32)],       # z accumulator
        ),
        compiler_params=pltpu.CompilerParams(
            dimension_semantics=("arbitrary",),   # K is a reduction axis
            vmem_limit_bytes=vmem_limit,
        ),
        cost_estimate=pl.CostEstimate(
            flops=2 * d * d + 12 * d,
            transcendentals=2 * d + 2,
            bytes_accessed=4 * (d * d + 8 * d + 4),
        ),
    )(arrays, w4, vec, scal)

    # torch returns hidden5 as (D, 1); the kernel emits it lane-dense (1, D)
    # and we transpose outside (free layout plumbing in XLA).
    return out, h5_row.T


def reference(arrays, params):
    """Pure-JAX mirror of the torch forward, for verification."""
    w4, b4, gamma, beta, w5, b5, wp, bp = params
    h = _sigmoid(arrays @ w4.T + b4)                           # (1, D)
    mu = jnp.mean(h, axis=-1, keepdims=True)
    var = jnp.mean((h - mu) ** 2, axis=-1, keepdims=True)
    hn = (h - mu) / jnp.sqrt(var + 1e-5) * gamma + beta        # (1, D)
    h5 = _sigmoid(hn.T * w5[0, 0] + b5[0])                     # (D, 1)
    out = h5.T @ wp.T + bp[0]                                  # (1, 1)
    return out, h5


def init_params(key, hidden_dim):
    """Deterministic init; shapes follow the nn.Module __init__."""
    ks = jax.random.split(key, 6)
    s = 1.0 / jnp.sqrt(jnp.float32(hidden_dim))
    w4 = jax.random.uniform(ks[0], (hidden_dim, hidden_dim), jnp.float32, -s, s)  # hidden4.weight
    b4 = jax.random.uniform(ks[1], (hidden_dim,), jnp.float32, -s, s)             # hidden4.bias
    gamma = jnp.ones((hidden_dim,), jnp.float32)                                  # _bn6.weight
    beta = jnp.zeros((hidden_dim,), jnp.float32)                                  # _bn6.bias
    w5 = jax.random.uniform(ks[2], (1, 1), jnp.float32, -1.0, 1.0)                # hidden5.weight
    b5 = jax.random.uniform(ks[3], (1,), jnp.float32, -1.0, 1.0)                  # hidden5.bias
    wp = jax.random.uniform(ks[4], (1, hidden_dim), jnp.float32, -s, s)           # predict.weight
    bp = jax.random.uniform(ks[5], (1,), jnp.float32, -s, s)                      # predict.bias
    return (w4, b4, gamma, beta, w5, b5, wp, bp)


if __name__ == "__main__":
    key = jax.random.PRNGKey(0)
    k_x, k_p = jax.random.split(key)

    D = 32                                # hidden_dim
    arrays = jax.random.normal(k_x, (1, D), jnp.float32)   # seq dim must be 1
    params = init_params(k_p, D)

    packed = pack_params(params)          # one-time packing, off the hot path

    out, h5 = split_model1(arrays, packed)
    out = jax.block_until_ready(out)
    h5 = jax.block_until_ready(h5)

    ref_out, ref_h5 = reference(arrays, params)
    assert out.shape == (1, 1) and h5.shape == (D, 1)
    assert jnp.allclose(out, ref_out, rtol=1e-4, atol=1e-5), (out, ref_out)
    assert jnp.allclose(h5, ref_h5, rtol=1e-4, atol=1e-5)

    print("KERNEL_OK")
</pallas_src>

<mosaic_0001>
module attributes {stable_mosaic.version = 11 : i64} {
  func.func @_split_model1_kernel(%arg0: i32, %arg1: memref<1x32xf32, #tpu.memory_space<vmem>>, %arg2: memref<32x32xf32, #tpu.memory_space<vmem>>, %arg3: memref<4x32xf32, #tpu.memory_space<vmem>>, %arg4: memref<3xf32, #tpu.memory_space<smem>>, %arg5: memref<1x1xf32, #tpu.memory_space<smem>>, %arg6: memref<1x32xf32, #tpu.memory_space<vmem>>, %arg7: memref<1x32xf32, #tpu.memory_space<vmem>>) attributes {dimension_semantics = [#tpu.dimension_semantics<arbitrary>], iteration_bounds = array<i64: 1>, scalar_prefetch = 0 : i64, scratch_operands = 1 : i64, tpu.core_type = #tpu.core_type<tc>, window_params = [{transform_indices = @transform_0, window_bounds = array<i64: 1, 32>}, {transform_indices = @transform_1, window_bounds = array<i64: 32, 32>}, {pipeline_mode = #tpu.pipeline_mode<synchronous>, transform_indices = @transform_2, window_bounds = array<i64: 4, 32>}, {transform_indices = @transform_3, window_bounds = array<i64: 3>}, {transform_indices = @transform_4, window_bounds = array<i64: 1, 1>}, {pipeline_mode = #tpu.pipeline_mode<synchronous>, transform_indices = @transform_5, window_bounds = array<i64: 1, 32>}]} {
    %c0_i32 = arith.constant 0 : i32
    %0 = arith.cmpi eq, %arg0, %c0_i32 : i32
    %1 = arith.extui %0 : i1 to i32
    %c0_i32_0 = arith.constant 0 : i32
    %2 = arith.cmpi ne, %1, %c0_i32_0 : i32
    scf.if %2 {
      %cst_10 = arith.constant 0.000000e+00 : f32
      %12 = vector.broadcast %cst_10 : f32 to vector<1x32xf32>
      %c0_11 = arith.constant 0 : index
      %c0_12 = arith.constant 0 : index
      %13 = vector.load %arg7[%c0_11, %c0_12] : memref<1x32xf32, #tpu.memory_space<vmem>>, vector<1x32xf32>
      tpu.vector_store %arg7[%c0_11, %c0_12], %12 {strides = array<i32>} : memref<1x32xf32, #tpu.memory_space<vmem>>, vector<1x32xf32>,
    } else {
    }
    %c0 = arith.constant 0 : index
    %c0_1 = arith.constant 0 : index
    %3 = vector.load %arg7[%c0, %c0_1] : memref<1x32xf32, #tpu.memory_space<vmem>>, vector<1x32xf32>
    %c0_2 = arith.constant 0 : index
    %c0_3 = arith.constant 0 : index
    %4 = vector.load %arg1[%c0_2, %c0_3] : memref<1x32xf32, #tpu.memory_space<vmem>>, vector<1x32xf32>
    %c0_4 = arith.constant 0 : index
    %c0_5 = arith.constant 0 : index
    %5 = vector.load %arg2[%c0_4, %c0_5] : memref<32x32xf32, #tpu.memory_space<vmem>>, vector<32x32xf32>
    %cst = arith.constant dense<0.000000e+00> : vector<1x32xf32>
    %6 = tpu.matmul %4, %5, %cst {dimension_numbers = #tpu.dot_dimension_numbers<[1], [1], [0], [0], [0, 0, 1, 0], [], []>} : vector<1x32xf32>, vector<32x32xf32>, vector<1x32xf32> -> vector<1x32xf32>
    %7 = arith.addf %3, %6 : vector<1x32xf32>
    %c0_6 = arith.constant 0 : index
    %c0_7 = arith.constant 0 : index
    %8 = vector.load %arg7[%c0_6, %c0_7] : memref<1x32xf32, #tpu.memory_space<vmem>>, vector<1x32xf32>
    tpu.vector_store %arg7[%c0_6, %c0_7], %7 {strides = array<i32>} : memref<1x32xf32, #tpu.memory_space<vmem>>, vector<1x32xf32>,
    %c0_i32_8 = arith.constant 0 : i32
    %9 = arith.cmpi eq, %arg0, %c0_i32_8 : i32
    %10 = arith.extui %9 : i1 to i32
    %c0_i32_9 = arith.constant 0 : i32
    %11 = arith.cmpi ne, %10, %c0_i32_9 : i32
    scf.if %11 {
      %c0_10 = arith.constant 0 : index
      %c0_11 = arith.constant 0 : index
      %12 = vector.load %arg3[%c0_10, %c0_11] : memref<4x32xf32, #tpu.memory_space<vmem>>, vector<4x32xf32>
      %13 = vector.extract_strided_slice %12 {offsets = [0, 0], sizes = [1, 32], strides = [1, 1]} : vector<4x32xf32> to vector<1x32xf32>
      %14 = vector.extract_strided_slice %12 {offsets = [1, 0], sizes = [1, 32], strides = [1, 1]} : vector<4x32xf32> to vector<1x32xf32>
      %15 = vector.extract_strided_slice %12 {offsets = [2, 0], sizes = [1, 32], strides = [1, 1]} : vector<4x32xf32> to vector<1x32xf32>
      %16 = vector.extract_strided_slice %12 {offsets = [3, 0], sizes = [1, 32], strides = [1, 1]} : vector<4x32xf32> to vector<1x32xf32>
      %c0_12 = arith.constant 0 : index
      %c0_13 = arith.constant 0 : index
      %17 = vector.load %arg7[%c0_12, %c0_13] : memref<1x32xf32, #tpu.memory_space<vmem>>, vector<1x32xf32>
      %18 = arith.addf %17, %13 : vector<1x32xf32>
      %cst_14 = arith.constant 5.000000e-01 : f32
      %19 = vector.broadcast %cst_14 : f32 to vector<1x32xf32>
      %20 = arith.mulf %19, %18 : vector<1x32xf32>
      %21 = math.tanh %20 : vector<1x32xf32>
      %cst_15 = arith.constant 5.000000e-01 : f32
      %22 = vector.broadcast %cst_15 : f32 to vector<1x32xf32>
      %23 = arith.mulf %22, %21 : vector<1x32xf32>
      %cst_16 = arith.constant 5.000000e-01 : f32
      %24 = vector.broadcast %cst_16 : f32 to vector<1x32xf32>
      %25 = arith.addf %23, %24 : vector<1x32xf32>
      %cst_17 = arith.constant dense<0.000000e+00> : vector<1xf32>
      %26 = vector.multi_reduction <add>, %25, %cst_17 [1] : vector<1x32xf32> to vector<1xf32>
      %27 = vector.shape_cast %26 : vector<1xf32> to vector<1x1xf32>
      %28 = arith.mulf %25, %25 : vector<1x32xf32>
      %cst_18 = arith.constant dense<0.000000e+00> : vector<1xf32>
      %29 = vector.multi_reduction <add>, %28, %cst_18 [1] : vector<1x32xf32> to vector<1xf32>
      %30 = vector.shape_cast %29 : vector<1xf32> to vector<1x1xf32>
      %cst_19 = arith.constant 3.125000e-02 : f32
      %31 = vector.broadcast %cst_19 : f32 to vector<1x1xf32>
      %32 = arith.mulf %27, %31 : vector<1x1xf32>
      %cst_20 = arith.constant 3.125000e-02 : f32
      %33 = vector.broadcast %cst_20 : f32 to vector<1x1xf32>
      %34 = arith.mulf %30, %33 : vector<1x1xf32>
      %35 = arith.mulf %32, %32 : vector<1x1xf32>
      %36 = arith.subf %34, %35 : vector<1x1xf32>
      %37 = vector.broadcast %32 : vector<1x1xf32> to vector<1x32xf32>
      %38 = arith.subf %25, %37 : vector<1x32xf32>
      %cst_21 = arith.constant 9.99999974E-6 : f32
      %39 = vector.broadcast %cst_21 : f32 to vector<1x1xf32>
      %40 = arith.addf %36, %39 : vector<1x1xf32>
      %41 = math.rsqrt %40 : vector<1x1xf32>
      %42 = vector.broadcast %41 : vector<1x1xf32> to vector<1x32xf32>
      %43 = arith.mulf %38, %42 : vector<1x32xf32>
      %44 = arith.mulf %43, %14 : vector<1x32xf32>
      %45 = arith.addf %44, %15 : vector<1x32xf32>
      %c0_22 = arith.constant 0 : index
      %46 = memref.load %arg4[%c0_22] : memref<3xf32, #tpu.memory_space<smem>>
      %c1 = arith.constant 1 : index
      %47 = memref.load %arg4[%c1] : memref<3xf32, #tpu.memory_space<smem>>
      %c2 = arith.constant 2 : index
      %48 = memref.load %arg4[%c2] : memref<3xf32, #tpu.memory_space<smem>>
      %49 = vector.broadcast %46 : f32 to vector<1x32xf32>
      %50 = arith.mulf %45, %49 : vector<1x32xf32>
      %51 = vector.broadcast %47 : f32 to vector<1x32xf32>
      %52 = arith.addf %50, %51 : vector<1x32xf32>
      %cst_23 = arith.constant 5.000000e-01 : f32
      %53 = vector.broadcast %cst_23 : f32 to vector<1x32xf32>
      %54 = arith.mulf %53, %52 : vector<1x32xf32>
      %55 = math.tanh %54 : vector<1x32xf32>
      %cst_24 = arith.constant 5.000000e-01 : f32
      %56 = vector.broadcast %cst_24 : f32 to vector<1x32xf32>
      %57 = arith.mulf %56, %55 : vector<1x32xf32>
      %cst_25 = arith.constant 5.000000e-01 : f32
      %58 = vector.broadcast %cst_25 : f32 to vector<1x32xf32>
      %59 = arith.addf %57, %58 : vector<1x32xf32>
      %c0_26 = arith.constant 0 : index
      %c0_27 = arith.constant 0 : index
      %60 = vector.load %arg6[%c0_26, %c0_27] : memref<1x32xf32, #tpu.memory_space<vmem>>, vector<1x32xf32>
      tpu.vector_store %arg6[%c0_26, %c0_27], %59 {strides = array<i32>} : memref<1x32xf32, #tpu.memory_space<vmem>>, vector<1x32xf32>,
      %61 = arith.mulf %59, %16 : vector<1x32xf32>
      %62 = vector.shape_cast %61 : vector<1x32xf32> to vector<1x1x32xf32>
      %cst_28 = arith.constant dense<0.000000e+00> : vector<1xf32>
      %63 = vector.multi_reduction <add>, %62, %cst_28 [1, 2] : vector<1x1x32xf32> to vector<1xf32>
      %64 = vector.shape_cast %63 : vector<1xf32> to vector<1x1x1xf32>
      %65 = vector.extract %64[0, 0, 0] : f32 from vector<1x1x1xf32>
      %66 = arith.addf %65, %48 : f32
      %c0_29 = arith.constant 0 : index
      %c0_30 = arith.constant 0 : index
      %67 = memref.load %arg5[%c0_29, %c0_30] : memref<1x1xf32, #tpu.memory_space<smem>>
      memref.store %66, %arg5[%c0_29, %c0_30] : memref<1x1xf32, #tpu.memory_space<smem>>
    } else {
    }
    return
  }
  func.func @transform_0(%arg0: i32) -> (i32, i32) {
    %c0_i32 = arith.constant 0 : i32
    %c0_i32_0 = arith.constant 0 : i32
    return %c0_i32, %arg0 : i32, i32
  }
  func.func @transform_1(%arg0: i32) -> (i32, i32) {
    %c0_i32 = arith.constant 0 : i32
    %c0_i32_0 = arith.constant 0 : i32
    return %c0_i32, %arg0 : i32, i32
  }
  func.func @transform_2(%arg0: i32) -> (i32, i32) {
    %c0_i32 = arith.constant 0 : i32
    %c0_i32_0 = arith.constant 0 : i32
    %c0_i32_1 = arith.constant 0 : i32
    return %c0_i32, %c0_i32_0 : i32, i32
  }
  func.func @transform_3(%arg0: i32) -> i32 {
    %c0_i32 = arith.constant 0 : i32
    %c0_i32_0 = arith.constant 0 : i32
    return %c0_i32 : i32
  }
  func.func @transform_4(%arg0: i32) -> (i32, i32) {
    %c0_i32 = arith.constant 0 : i32
    %c0_i32_0 = arith.constant 0 : i32
    %c0_i32_1 = arith.constant 0 : i32
    return %c0_i32, %c0_i32_0 : i32, i32
  }
  func.func @transform_5(%arg0: i32) -> (i32, i32) {
    %c0_i32 = arith.constant 0 : i32
    %c0_i32_0 = arith.constant 0 : i32
    %c0_i32_1 = arith.constant 0 : i32
    return %c0_i32, %c0_i32_0 : i32, i32
  }
}

</mosaic_0001>

<bundles_post_ra>
// kernel: split_model1.1
= control target key start
LH: loop header
LB: loop body
LE: loop exit
PB: predicated region body
PF: predicated region fallthrough
CT: control target
= control target key end

     0   :  { %11 = vsyncpa [#allocation4], 0  ;;  %s531_s0 = inlined_call_operand.hbm [shape: f32[1,32], index: 0, kind: input, shape index: {}]   ;;  %s532_s1 = inlined_call_operand.hbm [shape: f32[32,32], index: 1, kind: input, shape index: {}]   ;;  %s533_s2 = inlined_call_operand.vmem [shape: f32[4,32], index: 2, kind: input, shape index: {}]   ;;  %s534_s3 = inlined_call_operand.vmem [shape: f32[3], index: 3, kind: input, shape index: {}]   ;;  %s535_s4 = inlined_call_operand.hbm [shape: f32[1,1], index: 4, kind: output, shape index: {0}]   ;;  %s536_s5 = inlined_call_operand.hbm [shape: f32[1,32], index: 5, kind: output, shape index: {1}]  }
   0x1   :  { %12 = vsyncpa [#allocation9], 0 }
   0x2   :  { %13 = vsyncpa [#allocation7], 0 }
   0x3   :  { %14 = vsyncpa [#allocation6], 0 }
   0x4   :  { %15 = vsyncpa [#allocation5], 0  ;;  %s420_s18 = smov [#allocation3]   ;;  %s421_s20 = smov [#allocation8]  }
   0x5   :  { %s22_s19 = sshll.u32 %s420_s18, 4  ;;  %s31_s21 = sshll.u32 %s421_s20, 4  ;;  %s23_s19 = int_to_ptr.vmem [resolvable:$true] %s22_s19  ;;  %s461_s21 = int_to_ptr.vmem [resolvable:$true] %s31_s21 }
   0x6   :  { %s322_s24 = scalar_lea.hbm %s531_s0, 16 }
   0x7   :  { %p323_p0 = scmp.ne.s32.totalorder %s531_s0, %s322_s24  ;;  %p326_p1 = scmp.lt.u32.totalorder %s322_s24, %s531_s0 }
   0x9   :  { %p328_p2 = pnand %p326_p1, %p323_p0 }
   0xb   :  { %331 = shalt.err (!%p328_p2)
}
   0xc   :  { %s332_s29 = scalar_lea.vmem %s23_s19, 16  ;;  %s336_s30 = scalar_lea.vmem %s23_s19, 32 }
   0xd   :  { %p333_p3 = scmp.ne.s32.totalorder %s23_s19, %s332_s29  ;;  %p337_p4 = scmp.lt.s32.totalorder %s23_s19, %s23_s19 }
   0xe   :  { %p338_p5 = scmp.lt.s32.totalorder %s336_s30, %s332_s29 }
  0x10   :  { %p339_p6 = por %p338_p5, %p337_p4 }
  0x12   :  { %p340_p7 = pnand %p339_p6, %p333_p3 }
  0x14   :  { %343 = shalt.err (!%p340_p7)
}
  0x15   :  { %25 = dma.hbm_to_vmem [thread:$0]  %s531_s0, 16, %s23_s19, [#allocation4]  }
  0x16   :  { %s344_s10 = scalar_lea.hbm %s532_s1, 512 }
  0x17   :  { %p345_p8 = scmp.ne.s32.totalorder %s532_s1, %s344_s10  ;;  %p348_p9 = scmp.lt.u32.totalorder %s344_s10, %s532_s1 }
  0x19   :  { %p350_p10 = pnand %p348_p9, %p345_p8 }
  0x1b   :  { %353 = shalt.err (!%p350_p10)
}
  0x1c   :  { %s354_s15 = scalar_lea.vmem %s461_s21, 512  ;;  %p359_p12 = scmp.lt.s32.totalorder %s461_s21, %s461_s21 }
  0x1d   :  { %p355_p11 = scmp.ne.s32.totalorder %s461_s21, %s354_s15  ;;  %p360_p13 = scmp.lt.s32.totalorder %s354_s15, %s354_s15 }
  0x1f   :  { %p361_p0 = por %p360_p13, %p359_p12 }
  0x21   :  { %p362_p1 = pnand %p361_p0, %p355_p11 }
  0x23   :  { %365 = shalt.err (!%p362_p1)
}
  0x24   :  { %s422_s0 = smov 128   ;;  %s423_s16 = smov 8  }
  0x25   :  { %37 = dma.hbm_to_vmem [thread:$0]  %s532_s1, 512, %s461_s21, [#allocation9], %s422_s0, %s422_s0, %s423_s16  }
  0x26   :  { %s46_s22 = sshll.u32 %s534_s3, 4  ;;  %s47_s22 = int_to_ptr.vmem [resolvable:$true] %s46_s22 }
  0x27   :  { %s366_s23 = scalar_lea.vmem %s47_s22, 16  ;;  %p371_p3 = scmp.lt.s32.totalorder %s47_s22, %s47_s22 }
  0x28   :  { %p367_p2 = scmp.ne.s32.totalorder %s47_s22, %s366_s23  ;;  %p372_p4 = scmp.lt.s32.totalorder %s366_s23, %s366_s23 }
  0x2a   :  { %p373_p5 = por %p372_p4, %p371_p3 }
  0x2c   :  { %p374_p6 = pnand %p373_p5, %p367_p2 }
  0x2e   :  { %377 = shalt.err (!%p374_p6)
}
  0x2f   :  { %s424_s24 = smov [#allocation10]  }
  0x30   :  { %49 = dma.vmem_to_smem %s47_s22, 16, %s424_s24, [#allocation7]  }
  0x31   :  { %410 = dma.done.wait [#allocation4], 16  }
  0x32   :  { %411 = vsyncadd [#allocation4], 4294967280 }
  0x33   :  { %412 = dma.done.wait [#allocation9], 512  }
  0x34   :  { %413 = vsyncadd [#allocation9], 4294966784 }
  0x35   :  { %414 = dma.done.wait [#allocation7], 16  }
  0x36   :  { %415 = vsyncadd [#allocation7], 4294967280 }
  0x37   :  { %59 = sfence }
  0x38   :  { %v68_v0 = vld [vmem:[#allocation8] sm:$0xff]  ;;  %v69_v1 = vld [vmem:[#allocation8 + $0x8] sm:$0xff]  ;;  %vm72_vm0 = vcmask 261120   ;;  %vm64_vm1 = vcmask 253952   ;;  %v425_v2 = vmov 0.0|0.0   ;;  %v426_v4 = vmov 0.0  }
  0x39   :  { %295 = vmatprep.subr.bf16.mxu0 %v425_v2  ;;  %v296_v3 = vpack.c.bf16 %v69_v1, %v68_v0  ;;  %vm297_vm2 = vmpackc.low %vm72_vm0, %vm72_vm0  ;;  %65 = vst.msk [vmem:[#allocation2] sm:$0x1] %vm64_vm1, %v426_v4  ;;  %vm427_vm3 = vmmov 0   ;;  %v70_v5 = vld [vmem:[#allocation8 + $0x10] sm:$0xff]  ;;  %v71_v6 = vld [vmem:[#allocation8 + $0x18] sm:$0xff]  ;;  %v190_v26 = vlaneseq  ;;  %s277_s21 = sld [smem:[#allocation10 + $0x1]] }
  0x3a   :  { %292 = vmatprep.mubr.msk.f32.mxu0 %vm427_vm3, %v426_v4  ;;  %v300_v7 = vpack.c.bf16 %v71_v6, %v70_v5  ;;  %v67_v8 = vld [vmem:[#allocation3] sm:$0x1]  ;;  %v164_v13 = vld [vmem:[%s533_s2] sm:$0xf]  ;;  %v428_v24 = vmov 1966171168  }
  0x3b   :  { %298 = vmatpush3.bf16.xpose.msk.msra.mxu0 %vm297_vm2, %v296_v3  ;;  %v188_v25 = vunpack.c.l.s4 %v428_v24  ;;  %v191_v30 = vshrl.u32 %v190_v26, 7  ;;  %s214_s2 = sld [smem:[#allocation10]]  ;;  %s429_s25 = smov [#allocation12]  }
  0x3c   :  { %299 = vmatprep.subr.bf16.mxu0 %v425_v2  ;;  %s256_s26 = sshll.u32 %s429_s25, 4  ;;  %s257_s26 = int_to_ptr.vmem [resolvable:$true] %s256_s26 }
  0x3d   :  { %v189_v29 = vunpack.c.0.s8 %v188_v25  ;;  %s378_s27 = scalar_lea.vmem %s257_s26, 16  ;;  %s382_s28 = scalar_lea.vmem %s257_s26, 32 }
  0x3e   :  { %p379_p7 = scmp.ne.s32.totalorder %s257_s26, %s378_s27  ;;  %p383_p8 = scmp.lt.s32.totalorder %s257_s26, %s257_s26 }
  0x3f   :  { %v192_v34 = vsub.s32 %v189_v29, %v191_v30  ;;  %v219_v47 = vstv %s277_s21  ;;  %p384_p9 = scmp.lt.s32.totalorder %s382_s28, %s378_s27 }
  0x40   :  { %v66_v9 = vld [vmem:[#allocation2] sm:$0x1] }
  0x41   :  { %v193_v36 = vrot.slane %v164_v13, %v192_v34  ;;  %v217_v45 = vstv %s214_s2  ;;  %p385_p10 = por %p384_p9, %p383_p8 }
  0x43   :  { %302 = vmatpush3.bf16.xpose.msk.msra.mxu0 %vm297_vm2, %v300_v7  ;;  %v194_v37 = vcombine.high %v193_v36, %v193_v36  ;;  %v201_v38 = vrot.slane %v193_v36, %v192_v34  ;;  %p386_p11 = pnand %p385_p10, %p379_p7 }
  0x45   :  { %v208_v40 = vrot.slane %v194_v37, %v192_v34  ;;  %v211_v43 = vcombine.high %v201_v38, %v201_v38 }
  0x47   :  { %v226_v53 = vcombine.high %v208_v40, %v208_v40 }
  0x4a   :  { %293 = vmatmul.mubr.msk.f32.vlgmr.msra.gmra.mrb[0].mxu0 %vm72_vm0, %v67_v8 }
 0x11d   :  { %v154_v10 = vpop.f32.mrb[0].mxu0 }
 0x11e   :  { %v158_v11 = vadd.f32 %v154_v10, %v66_v9  ;;  %v294_v12 = vpop.f32.mrb[1].mxu0 }
 0x120   :  { %160 = vst.msk [vmem:[#allocation2] sm:$0x1] %vm64_vm1, %v158_v11 }
 0x127   :  { %v165_v14 = vld [vmem:[#allocation2] sm:$0x1] }
 0x128   :  { %v166_v15 = vadd.f32 %v165_v14, %v164_v13 }
 0x12a   :  { %v167_v16 = vmul.f32 0.5, %v166_v15 }
 0x12c   :  { %316 = vtanh.f32 %v167_v16 }
 0x136   :  { %v317_v17 = vpop.eup %316 }
 0x137   :  { %v169_v18 = vmul.f32 0.5, %v317_v17 }
 0x139   :  { %v170_v19 = vadd.f32 0.5, %v169_v18 }
 0x13b   :  { %v171_v20 = vsel %vm64_vm1, %v170_v19, 0.0  ;;  %v174_v21 = vmul.f32 %v170_v19, %v170_v19 }
 0x13c   :  { %172 = vadd.xlane.f32.xlu0 %v171_v20 }
 0x13d   :  { %v175_v22 = vsel %vm64_vm1, %v174_v21, 0.0 }
 0x140   :  { %176 = vadd.xlane.f32.xlu0 %v175_v22 }
 0x1c9   :  { %v173_v23 = vpop.xlane.xlu0 %172 }
 0x1ca   :  { %v178_v27 = vmul.f32 0.03125, %v173_v23 }
 0x1cc   :  { %v180_v31 = vmul.f32 %v178_v27, %v178_v27  ;;  %v182_v39 = vsub.f32 %v170_v19, %v178_v27 }
 0x1cd   :  { %v177_v28 = vpop.xlane.xlu0 %176 }
 0x1ce   :  { %v179_v32 = vmul.f32 0.03125, %v177_v28 }
 0x1d0   :  { %v181_v33 = vsub.f32 %v179_v32, %v180_v31 }
 0x1d2   :  { %v183_v35 = vadd.f32 1e-05, %v181_v33 }
 0x1d4   :  { %318 = vrsqrt.f32 %v183_v35 }
 0x1de   :  { %v319_v41 = vpop.eup %318 }
 0x1df   :  { %v185_v42 = vmul.f32 %v319_v41, %v182_v39 }
 0x1e1   :  { %v210_v44 = vmul.f32 %v208_v40, %v185_v42 }
 0x1e3   :  { %v213_v46 = vadd.f32 %v211_v43, %v210_v44 }
 0x1e5   :  { %v218_v48 = vmul.f32 %v217_v45, %v213_v46 }
 0x1e7   :  { %v220_v49 = vadd.f32 %v219_v47, %v218_v48 }
 0x1e9   :  { %v221_v50 = vmul.f32 0.5, %v220_v49 }
 0x1eb   :  { %320 = vtanh.f32 %v221_v50 }
 0x1f5   :  { %v321_v51 = vpop.eup %320 }
 0x1f6   :  { %v223_v52 = vmul.f32 0.5, %v321_v51 }
 0x1f8   :  { %v224_v54 = vadd.f32 0.5, %v223_v52 }
 0x1fa   :  { %v228_v55 = vmul.f32 %v226_v53, %v224_v54  ;;  %225 = vst.msk [vmem:[#allocation12] sm:$0x1] %vm64_vm1, %v224_v54 }
 0x1fc   :  { %v229_v56 = vsel %vm64_vm1, %v228_v55, 0.0 }
 0x1fd   :  { %230 = vadd.xlane.f32.xlu1 %v229_v56 }
 0x1fe   :  { %389 = shalt.err (!%p386_p11)
}
 0x1ff   :  { %s390_s6 = scalar_lea.hbm %s536_s5, 16 }
 0x200   :  { %p391_p12 = scmp.ne.s32.totalorder %s536_s5, %s390_s6  ;;  %p394_p13 = scmp.lt.u32.totalorder %s390_s6, %s536_s5 }
 0x202   :  { %p396_p0 = pnand %p394_p13, %p391_p12 }
 0x204   :  { %399 = shalt.err (!%p396_p0)
}
 0x205   :  { %259 = dma.vmem_to_hbm [thread:$0]  %s257_s26, 16, %s536_s5, [#allocation5]  }
 0x206   :  { %s278_s13 = sld [smem:[#allocation10 + $0x2]]  ;;  %s400_s17 = scalar_lea.hbm %s535_s4, 16 }
 0x207   :  { %p401_p1 = scmp.ne.s32.totalorder %s535_s4, %s400_s17  ;;  %p404_p2 = scmp.lt.u32.totalorder %s400_s17, %s535_s4 }
 0x209   :  { %p406_p3 = pnand %p404_p2, %p401_p1 }
 0x28a   :  { %v231_v57 = vpop.xlane.xlu1 %230 }
 0x28b   :  { %v232_v58 = vrot.slane %v231_v57, 4 }
 0x28d   :  { %v233_v59 = vadd.f32 %v232_v58, %v231_v57 }
 0x28f   :  { %v234_v60 = vrot.slane %v233_v59, 2 }
 0x291   :  { %v235_v61 = vadd.f32 %v234_v60, %v233_v59 }
 0x293   :  { %v236_v62 = vrot.slane %v235_v61, 1 }
 0x295   :  { %v237_v63 = vadd.f32 %v236_v62, %v235_v61 }
 0x297   :  { %303 = vpush %v237_v63 }
 0x2c8   :  { %s304_s14 = spop %303 }
 0x2c9   :  { %s239_s15 = sadd.f32 %s304_s14, %s278_s13 }
 0x2cb   :  { %241 = sst [smem:[#allocation11]] %s239_s15 }
 0x2cc   :  { %409 = shalt.err (!%p406_p3)
}
 0x2cd   :  { %s430_s22 = smov [#allocation11]  }
 0x2ce   :  { %249 = dma.smem_to_hbm %s430_s22, 16, %s535_s4, [#allocation6]  }
 0x2cf   :  { %416 = dma.done.wait [#allocation6], 16  }
 0x2d0   :  { %417 = vsyncadd [#allocation6], 4294967280 }
 0x2d1   :  { %418 = dma.done.wait [#allocation5], 16  }
 0x2d2   :  { %419 = vsyncadd [#allocation5], 4294967280 }
 0x2d3   :  { %266 = sfence }
 0x2d4   :  { %267 = vsyncpa [#allocation4], 1 }
 0x2d5   :  { %268 = vsyncpa [#allocation9], 1 }
 0x2d6   :  { %269 = vsyncpa [#allocation5], 1 }
 0x2d7   :  { %270 = vsyncpa [#allocation6], 1 }
 0x2d8   :  { %271 = vsyncpa [#allocation7], 1 }

</bundles_post_ra>
